<compile_context>
chip_gen: v6e
topology: v6e:2x2x1
jax: 0.10.0
libtpu: 0.0.40
codegen_flags: <defaults>
</compile_context>

<pallas_src>
import functools

import jax
import jax.numpy as jnp
from jax import lax
from jax.experimental import pallas as pl
from jax.experimental.pallas import tpu as pltpu

LN_EPS = 1e-5  # PyTorch nn.LayerNorm default


def _resblock_kernel(x_ref, wt_ref, b_ref, o_ref, *, inv_h, matmul_dtype):
    # x_ref:  (tm, H) f32 row tile
    # wt_ref: (H, H) pre-transposed, gamma-fused weight (gamma ⊙ W^T) in matmul_dtype
    # b_ref:  (1, H) f32 fused bias (W @ beta + b)
    x = x_ref[...]

    # --- LayerNorm statistics over the hidden dim (f32) ---
    mu = jnp.sum(x, axis=-1, keepdims=True) * inv_h
    xc = x - mu
    var = jnp.sum(xc * xc, axis=-1, keepdims=True) * inv_h
    xn = xc * lax.rsqrt(var + LN_EPS)

    # --- Fused affine + Linear: xn @ (gamma ⊙ W^T) + (W @ beta + b), MXU f32 acc ---
    z = jnp.dot(xn.astype(matmul_dtype), wt_ref[...],
                preferred_element_type=jnp.float32)
    z = z + b_ref[...]

    # --- Dropout (eval mode: identity) + residual add ---
    # TODO(synk): training-mode dropout (pltpu.prng_random_bits mask) not wired in.
    o_ref[...] = (x + z).astype(o_ref.dtype)


def _round_up(x, m):
    return ((x + m - 1) // m) * m


@functools.partial(jax.jit, static_argnames=("row_tile", "matmul_dtype"))
def residual_block(x, gamma, beta, w, b, *, row_tile=256,
                   matmul_dtype=jnp.float32):
    """x: (B, S, H). w: (H, H) in PyTorch Linear layout (out, in). Returns (B, S, H)."""
    B, S, H = x.shape
    M = B * S

    # Effective row tile: multiple of 8 (sublane), no larger than the padded
    # row count.  For real workloads the grid keeps many iterations, letting
    # the "parallel" axis shard across v7x's two TensorCores.
    tm = min(_round_up(row_tile, 8), _round_up(M, 8))
    M_pad = _round_up(M, tm)

    x2 = x.reshape(M, H).astype(jnp.float32)
    if M_pad != M:
        x2 = jnp.pad(x2, ((0, M_pad - M), (0, 0)))  # zero rows; LN of zeros is finite

    gamma_f = gamma.astype(jnp.float32)
    beta_f = beta.astype(jnp.float32)
    w_f = w.astype(jnp.float32)

    # Fold the LayerNorm affine into the Linear (wrapper-side, once):
    #   (xn*gamma + beta) @ W^T + b == xn @ (gamma ⊙ W^T) + (W @ beta + b)
    # Pre-transpose (out,in) -> (in,out) so the kernel does a plain row-major dot.
    wt_fused = jnp.transpose(w_f * gamma_f[None, :]).astype(matmul_dtype)
    b_fused = (w_f @ beta_f + b.astype(jnp.float32)).reshape(1, H)

    # VMEM budget: double-buffered x/out tiles + fused weight + bias, 2x
    # headroom, clamped to [32 MiB, 64 MiB] so it is valid on v5e/v6e/v7x.
    itemsize = jnp.dtype(matmul_dtype).itemsize
    need = 2 * (2 * tm * H * 4) + 2 * H * H * itemsize + 4 * H * 4
    vmem_limit = int(min(max(2 * need, 32 * 1024 * 1024), 64 * 1024 * 1024))

    kernel = functools.partial(_resblock_kernel, inv_h=1.0 / H,
                               matmul_dtype=matmul_dtype)

    out2 = pl.pallas_call(
        kernel,
        out_shape=jax.ShapeDtypeStruct((M_pad, H), x.dtype),
        grid_spec=pltpu.PrefetchScalarGridSpec(
            num_scalar_prefetch=0,
            grid=(M_pad // tm,),
            in_specs=[
                pl.BlockSpec((tm, H), lambda i: (i, 0)),   # x row tile
                pl.BlockSpec((H, H), lambda i: (0, 0)),    # gamma ⊙ W^T (invariant)
                pl.BlockSpec((1, H), lambda i: (0, 0)),    # fused bias  (invariant)
            ],
            out_specs=pl.BlockSpec((tm, H), lambda i: (i, 0)),
        ),
        compiler_params=pltpu.CompilerParams(
            dimension_semantics=("parallel",),
            vmem_limit_bytes=vmem_limit,
        ),
    )(x2, wt_fused, b_fused)

    return out2[:M].reshape(B, S, H)


def _reference(x, gamma, beta, w, b):
    mu = jnp.mean(x, axis=-1, keepdims=True)
    var = jnp.mean((x - mu) ** 2, axis=-1, keepdims=True)
    xn = (x - mu) / jnp.sqrt(var + LN_EPS)
    y = xn * gamma + beta
    z = jnp.einsum("bsh,oh->bso", y, w) + b
    return x + z  # dropout is identity in eval mode


if __name__ == "__main__":
    B, S, H = 2, 8, 32

    key = jax.random.PRNGKey(0)
    kx, kw, kb, kg, kbt = jax.random.split(key, 5)

    x = jax.random.normal(kx, (B, S, H), dtype=jnp.float32)

    # Deterministic parameter init (shapes from nn.LayerNorm(H), nn.Linear(H, H)).
    gamma = jnp.ones((H,), dtype=jnp.float32)   # LayerNorm default weight
    beta = jnp.zeros((H,), dtype=jnp.float32)   # LayerNorm default bias
    w = jax.random.normal(kw, (H, H), dtype=jnp.float32) * (1.0 / jnp.sqrt(H))
    b = jax.random.normal(kb, (H,), dtype=jnp.float32) * 0.01

    out = jax.block_until_ready(residual_block(x, gamma, beta, w, b))
    ref = _reference(x, gamma, beta, w, b)
    assert out.shape == (B, S, H)
    assert jnp.allclose(out, ref, atol=1e-4, rtol=1e-4), "mismatch vs reference"

    # Non-trivial LayerNorm affine exercises the gamma/beta folding path.
    gamma2 = 1.0 + 0.1 * jax.random.normal(kg, (H,), dtype=jnp.float32)
    beta2 = 0.1 * jax.random.normal(kbt, (H,), dtype=jnp.float32)
    out_a = jax.block_until_ready(residual_block(x, gamma2, beta2, w, b))
    ref_a = _reference(x, gamma2, beta2, w, b)
    assert jnp.allclose(out_a, ref_a, atol=1e-4, rtol=1e-4), "affine mismatch"

    # Ragged row count (B*S not a multiple of the tile) exercises the padding path.
    x_r = jax.random.normal(kx, (3, 5, H), dtype=jnp.float32)
    out_r = jax.block_until_ready(residual_block(x_r, gamma2, beta2, w, b))
    ref_r = _reference(x_r, gamma2, beta2, w, b)
    assert jnp.allclose(out_r, ref_r, atol=1e-4, rtol=1e-4), "ragged mismatch"

    print("KERNEL_OK")
</pallas_src>

<mosaic_0001>
module attributes {stable_mosaic.version = 11 : i64} {
  func.func @_resblock_kernel(%arg0: i32, %arg1: memref<16x32xf32, #tpu.memory_space<vmem>>, %arg2: memref<32x32xf32, #tpu.memory_space<vmem>>, %arg3: memref<1x32xf32, #tpu.memory_space<vmem>>, %arg4: memref<16x32xf32, #tpu.memory_space<vmem>>) attributes {dimension_semantics = [#tpu.dimension_semantics<parallel>], iteration_bounds = array<i64: 1>, scalar_prefetch = 0 : i64, scratch_operands = 0 : i64, tpu.core_type = #tpu.core_type<tc>, window_params = [{transform_indices = @transform_0, window_bounds = array<i64: 16, 32>}, {pipeline_mode = #tpu.pipeline_mode<synchronous>, transform_indices = @transform_1, window_bounds = array<i64: 32, 32>}, {pipeline_mode = #tpu.pipeline_mode<synchronous>, transform_indices = @transform_2, window_bounds = array<i64: 1, 32>}, {transform_indices = @transform_3, window_bounds = array<i64: 16, 32>}]} {
    %c0 = arith.constant 0 : index
    %c0_0 = arith.constant 0 : index
    %0 = vector.load %arg1[%c0, %c0_0] : memref<16x32xf32, #tpu.memory_space<vmem>>, vector<16x32xf32>
    %cst = arith.constant dense<0.000000e+00> : vector<16xf32>
    %1 = vector.multi_reduction <add>, %0, %cst [1] : vector<16x32xf32> to vector<16xf32>
    %2 = vector.shape_cast %1 : vector<16xf32> to vector<16x1xf32>
    %cst_1 = arith.constant 3.125000e-02 : f32
    %3 = vector.broadcast %cst_1 : f32 to vector<16x1xf32>
    %4 = arith.mulf %2, %3 : vector<16x1xf32>
    %5 = vector.broadcast %4 : vector<16x1xf32> to vector<16x32xf32>
    %6 = arith.subf %0, %5 : vector<16x32xf32>
    %7 = arith.mulf %6, %6 : vector<16x32xf32>
    %cst_2 = arith.constant dense<0.000000e+00> : vector<16xf32>
    %8 = vector.multi_reduction <add>, %7, %cst_2 [1] : vector<16x32xf32> to vector<16xf32>
    %9 = vector.shape_cast %8 : vector<16xf32> to vector<16x1xf32>
    %cst_3 = arith.constant 3.125000e-02 : f32
    %10 = vector.broadcast %cst_3 : f32 to vector<16x1xf32>
    %11 = arith.mulf %9, %10 : vector<16x1xf32>
    %cst_4 = arith.constant 9.99999974E-6 : f32
    %12 = vector.broadcast %cst_4 : f32 to vector<16x1xf32>
    %13 = arith.addf %11, %12 : vector<16x1xf32>
    %14 = math.rsqrt %13 : vector<16x1xf32>
    %15 = vector.broadcast %14 : vector<16x1xf32> to vector<16x32xf32>
    %16 = arith.mulf %6, %15 : vector<16x32xf32>
    %c0_5 = arith.constant 0 : index
    %c0_6 = arith.constant 0 : index
    %17 = vector.load %arg2[%c0_5, %c0_6] : memref<32x32xf32, #tpu.memory_space<vmem>>, vector<32x32xf32>
    %cst_7 = arith.constant dense<0.000000e+00> : vector<16x32xf32>
    %18 = tpu.matmul %16, %17, %cst_7 {dimension_numbers = #tpu.dot_dimension_numbers<[1], [0], [0], [1], [0, 0, 1, 1], [], []>} : vector<16x32xf32>, vector<32x32xf32>, vector<16x32xf32> -> vector<16x32xf32>
    %c0_8 = arith.constant 0 : index
    %c0_9 = arith.constant 0 : index
    %19 = vector.load %arg3[%c0_8, %c0_9] : memref<1x32xf32, #tpu.memory_space<vmem>>, vector<1x32xf32>
    %20 = vector.broadcast %19 : vector<1x32xf32> to vector<16x32xf32>
    %21 = arith.addf %18, %20 : vector<16x32xf32>
    %22 = arith.addf %0, %21 : vector<16x32xf32>
    %c0_10 = arith.constant 0 : index
    %c0_11 = arith.constant 0 : index
    %23 = vector.load %arg4[%c0_10, %c0_11] : memref<16x32xf32, #tpu.memory_space<vmem>>, vector<16x32xf32>
    tpu.vector_store %arg4[%c0_10, %c0_11], %22 {strides = array<i32>} : memref<16x32xf32, #tpu.memory_space<vmem>>, vector<16x32xf32>,
    return
  }
  func.func @transform_0(%arg0: i32) -> (i32, i32) {
    %c0_i32 = arith.constant 0 : i32
    %c0_i32_0 = arith.constant 0 : i32
    return %arg0, %c0_i32 : i32, i32
  }
  func.func @transform_1(%arg0: i32) -> (i32, i32) {
    %c0_i32 = arith.constant 0 : i32
    %c0_i32_0 = arith.constant 0 : i32
    %c0_i32_1 = arith.constant 0 : i32
    return %c0_i32, %c0_i32_0 : i32, i32
  }
  func.func @transform_2(%arg0: i32) -> (i32, i32) {
    %c0_i32 = arith.constant 0 : i32
    %c0_i32_0 = arith.constant 0 : i32
    %c0_i32_1 = arith.constant 0 : i32
    return %c0_i32, %c0_i32_0 : i32, i32
  }
  func.func @transform_3(%arg0: i32) -> (i32, i32) {
    %c0_i32 = arith.constant 0 : i32
    %c0_i32_0 = arith.constant 0 : i32
    return %arg0, %c0_i32 : i32, i32
  }
}

</mosaic_0001>

<bundles_post_ra>
// kernel: residual_block.1
= control target key start
LH: loop header
LB: loop body
LE: loop exit
PB: predicated region body
PF: predicated region fallthrough
CT: control target
= control target key end

     0   :  { %vm17_vm0 = vcmask 261120   ;;  %s260_s0 = inlined_call_operand.vmem [shape: f32[16,32], index: 0, kind: input, shape index: {}]   ;;  %s261_s1 = inlined_call_operand.vmem [shape: f32[32,32], index: 1, kind: input, shape index: {}]   ;;  %s262_s2 = inlined_call_operand.vmem [shape: f32[1,32], index: 2, kind: input, shape index: {}]   ;;  %s263_s3 = inlined_call_operand.hbm [shape: f32[16,32], index: 3, kind: output, shape index: {}]  }
   0x1   :  { %v15_v0 = vld [vmem:[%s260_s0] sm:$0xff]  ;;  %v16_v1 = vld [vmem:[%s260_s0 + $0x8] sm:$0xff] }
   0x2   :  { %8 = vsyncpa [#allocation3], 0  ;;  %v18_v2 = vsel %vm17_vm0, %v15_v0, 0.0  ;;  %v21_v3 = vsel %vm17_vm0, %v16_v1, 0.0  ;;  %v47_v14 = vld [vmem:[%s261_s1 + $0x18] sm:$0xff]  ;;  %v46_v15 = vld [vmem:[%s261_s1 + $0x10] sm:$0xff] }
   0x3   :  { %19 = vadd.xlane.f32.xlu0 %v18_v2  ;;  %165 = vmatprep.subr.mxu0 %v47_v14  ;;  %v45_v16 = vld [vmem:[%s261_s1 + $0x8] sm:$0xff]  ;;  %v44_v17 = vld [vmem:[%s261_s1] sm:$0xff]  ;;  %s205_s24 = smov [#allocation2]  }
   0x4   :  { %166 = vmatpush3.msra.mxu0 %v47_v14  ;;  %v156_v28 = vld [vmem:[%s262_s2] ss:$0 sm:$0xff]  ;;  %s145_s25 = sshll.u32 %s205_s24, 4  ;;  %s146_s25 = int_to_ptr.vmem [resolvable:$true] %s145_s25 }
   0x5   :  { %167 = vmatprep.subr.mxu0 %v46_v15  ;;  %s183_s26 = scalar_lea.vmem %s146_s25, 256  ;;  %p188_p1 = scmp.lt.s32.totalorder %s146_s25, %s146_s25 }
   0x6   :  { %168 = vmatpush3.msra.mxu0 %v46_v15  ;;  %p184_p0 = scmp.ne.s32.totalorder %s146_s25, %s183_s26  ;;  %p189_p2 = scmp.lt.s32.totalorder %s183_s26, %s183_s26 }
   0x7   :  { %22 = vadd.xlane.f32.xlu0 %v21_v3  ;;  %169 = vmatprep.subr.mxu0 %v45_v16 }
   0x8   :  { %170 = vmatpush3.msra.mxu0 %v45_v16  ;;  %p190_p3 = por %p189_p2, %p188_p1 }
   0x9   :  { %171 = vmatprep.subr.mxu0 %v44_v17 }
   0xa   :  { %172 = vmatpush3.msra.mxu0 %v44_v17  ;;  %p191_p4 = pnand %p190_p3, %p184_p0 }
  0x8c   :  { %v20_v4 = vpop.xlane.xlu0 %19 }
  0x8d   :  { %v24_v5 = vmul.f32 0.03125, %v20_v4 }
  0x8f   :  { %v26_v6 = vsub.f32 %v15_v0, %v24_v5 }
  0x90   :  { %v23_v7 = vpop.xlane.xlu0 %22 }
  0x91   :  { %v25_v8 = vmul.f32 0.03125, %v23_v7  ;;  %v28_v9 = vmul.f32 %v26_v6, %v26_v6 }
  0x93   :  { %v27_v10 = vsub.f32 %v16_v1, %v25_v8  ;;  %v30_v11 = vsel %vm17_vm0, %v28_v9, 0.0 }
  0x94   :  { %31 = vadd.xlane.f32.xlu1 %v30_v11 }
  0x95   :  { %v29_v12 = vmul.f32 %v27_v10, %v27_v10 }
  0x97   :  { %v33_v13 = vsel %vm17_vm0, %v29_v12, 0.0 }
  0x98   :  { %34 = vadd.xlane.f32.xlu1 %v33_v13 }
 0x11d   :  { %v32_v18 = vpop.xlane.xlu1 %31 }
 0x11e   :  { %v36_v19 = vmul.f32 0.03125, %v32_v18 }
 0x120   :  { %v38_v20 = vadd.f32 1e-05, %v36_v19 }
 0x121   :  { %v35_v21 = vpop.xlane.xlu1 %34 }
 0x122   :  { %179 = vrsqrt.f32 %v38_v20  ;;  %v37_v22 = vmul.f32 0.03125, %v35_v21 }
 0x124   :  { %v39_v23 = vadd.f32 1e-05, %v37_v22 }
 0x126   :  { %181 = vrsqrt.f32 %v39_v23 }
 0x12f   :  { %v180_v24 = vpop.eup %179 }
 0x130   :  { %v42_v25 = vmul.f32 %v180_v24, %v26_v6 }
 0x132   :  { %173 = vmatprep.mubr.msk.f32.mxu0 %vm17_vm0, %v42_v25 }
 0x133   :  { %v182_v26 = vpop.eup %181 }
 0x134   :  { %v43_v27 = vmul.f32 %v182_v26, %v27_v10 }
 0x136   :  { %174 = vmatmul.mubr.msk.f32.vlgmr.msra.gmra.mxu0 %vm17_vm0, %v43_v27 }
 0x1f6   :  { %v175_v29 = vpop.f32.mrf.mxu0 }
 0x1f7   :  { %v133_v30 = vadd.f32 %v175_v29, %v156_v28 }
 0x1f8   :  { %v127_v31 = vpop.f32.mrf.mxu0 }
 0x1f9   :  { %v137_v32 = vadd.f32 %v133_v30, %v16_v1  ;;  %v128_v33 = vadd.f32 %v156_v28, %v127_v31 }
 0x1fb   :  { %139 = vst.msk [vmem:[#allocation2 + $0x8] sm:$0xff] %vm17_vm0, %v137_v32  ;;  %v136_v34 = vadd.f32 %v128_v33, %v15_v0 }
 0x1fd   :  { %138 = vst.msk [vmem:[#allocation2] sm:$0xff] %vm17_vm0, %v136_v34 }
 0x1fe   :  { %194 = shalt.err (!%p191_p4)
}
 0x1ff   :  { %s206_s2 = smov 128   ;;  %s207_s27 = smov 8  }
 0x200   :  { %151 = dma.vmem_to_hbm [thread:$0]  %s146_s25, 256, %s263_s3, [#allocation3], %s206_s2, %s206_s2, %s207_s27  }
 0x201   :  { %203 = dma.done.wait [#allocation3], 256  }
 0x202   :  { %204 = vsyncadd [#allocation3], 4294967040 }
 0x203   :  { %155 = vsyncpa [#allocation3], 1 }

</bundles_post_ra>
